<compile_context>
chip_gen: v7x
topology: tpu7x:2x2x1
jax: 0.10.0
libtpu: 0.0.40
codegen_flags: <defaults>
</compile_context>

<pallas_src>
import functools

import jax
import jax.numpy as jnp
from jax.experimental import pallas as pl
from jax.experimental.pallas import tpu as pltpu


# ----------------------------- Kernel 1: LN1 + fused QKV -----------------------------
def ln_qkv_kernel(x_ref, wqkv_ref, bqkv_ref, qkv_ref):
    x = x_ref[0].astype(jnp.float32)                           # (TQ, E)
    mu = jnp.mean(x, axis=-1, keepdims=True)
    var = jnp.mean((x - mu) ** 2, axis=-1, keepdims=True)
    # LN1 affine is folded into wqkv / bqkv (exact fold at param prep).
    h = ((x - mu) * jax.lax.rsqrt(var + 1e-5)).astype(jnp.bfloat16)
    qkv = jnp.dot(h, wqkv_ref[...], preferred_element_type=jnp.float32) + bqkv_ref[0]
    qkv_ref[0] = qkv.astype(qkv_ref.dtype)                     # bf16 store (half HBM traffic)


# ------------- Kernel 2: flash attention + Wo + residual + LN2 + FFN + residual -------------
def attn_ffn_kernel(x_ref, q_ref, k_ref, v_ref,
                    wo_ref, bo_ref,
                    wf1_ref, bf1_ref, wf2_ref, bf2_ref,
                    o_ref,
                    m_sc, l_sc, acc_sc,
                    *, n_heads: int, tq: int, tk: int):
    qi = pl.program_id(1)
    ki = pl.program_id(2)

    @pl.when(ki == 0)
    def _init():
        m_sc[...] = jnp.full_like(m_sc, -jnp.inf)
        l_sc[...] = jnp.zeros_like(l_sc)
        acc_sc[...] = jnp.zeros_like(acc_sc)

    first_row = qi * tq
    last_row = first_row + (tq - 1)
    first_col = ki * tk
    last_col = first_col + (tk - 1)

    def _accum(masked):
        q = q_ref[...]                                         # (H, TQ, hs) bf16, scale folded in
        k = k_ref[...]                                         # (H, hs, TK) bf16 (pre-transposed)
        v = v_ref[...]                                         # (H, TK, hs) bf16
        s = jnp.einsum('hqd,hdk->hqk', q, k,
                       preferred_element_type=jnp.float32)     # (H, TQ, TK) f32 accumulate
        if masked:
            row = first_row + jax.lax.broadcasted_iota(jnp.int32, (tq, tk), 0)
            col = first_col + jax.lax.broadcasted_iota(jnp.int32, (tq, tk), 1)
            s = jnp.where((col <= row)[None, :, :], s, -jnp.inf)
        m_prev = m_sc[...]
        m_new = jnp.maximum(m_prev, jnp.max(s, axis=-1, keepdims=True))
        alpha = jnp.exp(m_prev - m_new)
        p = jnp.exp(s - m_new)
        l_sc[...] = alpha * l_sc[...] + jnp.sum(p, axis=-1, keepdims=True)
        acc_sc[...] = alpha * acc_sc[...] + jnp.einsum(
            'hqk,hkd->hqd', p.astype(jnp.bfloat16), v,
            preferred_element_type=jnp.float32)
        m_sc[...] = m_new

    # kv tile fully below/at the diagonal: no mask needed (skip iota/compare/select).
    @pl.when(last_col <= first_row)
    def _unmasked():
        _accum(False)

    # Diagonal-straddling tile: tile-local causal mask. (kv tile 0 always has a valid column
    # for every row, so the running max is finite before any rescale -> no NaNs.)
    @pl.when(jnp.logical_and(first_col <= last_row, last_col > first_row))
    def _masked():
        _accum(True)

    # Tiles fully above the diagonal: no compute, and their K/V DMA is clamped away in the
    # index_map, so they cost neither bandwidth nor MXU/VPU work.

    @pl.when(ki == pl.num_programs(2) - 1)
    def _finalize():
        x = x_ref[0].astype(jnp.float32)                       # (TQ, E) residual in f32
        inv_l = pl.reciprocal(l_sc[...], approx=True)          # EUP slot, not VALU
        heads = (acc_sc[...] * inv_l).astype(jnp.bfloat16)     # (H, TQ, hs)

        # Output projection: per-head accumulation into head-major Wo (bf16 -> f32 acc).
        # TODO(synk): fuse into one (TQ,E)@(E,E) matmul at production hs (>=128).
        attn = jnp.zeros(x.shape, jnp.float32)
        for h in range(n_heads):                               # static, small
            attn = attn + jnp.dot(heads[h], wo_ref[h],
                                  preferred_element_type=jnp.float32)
        attn = attn + bo_ref[0]

        x1 = x + attn                                          # residual 1 (dropout = identity)

        # LayerNorm 2 (affine folded into wf1 / bf1 at param prep).
        mu = jnp.mean(x1, axis=-1, keepdims=True)
        var = jnp.mean((x1 - mu) ** 2, axis=-1, keepdims=True)
        h2 = ((x1 - mu) * jax.lax.rsqrt(var + 1e-5)).astype(jnp.bfloat16)

        # FFN: E -> 4E -> E, exact-erf GELU (matches nn.GELU default). bf16 in, f32 accumulate.
        f = jnp.dot(h2, wf1_ref[...], preferred_element_type=jnp.float32) + bf1_ref[0]
        f = jax.nn.gelu(f, approximate=False)
        f = jnp.dot(f.astype(jnp.bfloat16), wf2_ref[...],
                    preferred_element_type=jnp.float32) + bf2_ref[0]

        o_ref[0] = (x1 + f).astype(o_ref.dtype)                # residual 2 (dropout = identity)


# ------------------------------------ wrapper ------------------------------------
def transformer_block(x, params, *, n_heads: int, tq: int = 256, tk: int = 256):
    """x: (B, T, E) float32. params: weights in (in, out) layout, biases (1, dim), f32."""
    B, T, E = x.shape
    assert E % n_heads == 0
    hs = E // n_heads
    HID = 4 * E
    TQ = min(tq, T)
    TK = min(tk, T)
    assert T % TQ == 0 and T % TK == 0
    assert TQ == T or TQ % 16 == 0
    assert TK == T or TK % 128 == 0

    bf16 = jnp.bfloat16
    scale = hs ** -0.5

    # ---- param prep: exact algebraic folds in f32, matmul weights stored in bf16 ----
    # Fold 1/sqrt(hs) into Q projection; fuse Q/K/V into one (E, 3E) weight.
    wqkv = jnp.concatenate([params["wq"] * scale, params["wk"], params["wv"]], axis=1)
    bqkv = jnp.concatenate([params["bq"] * scale, params["bk"], params["bv"]], axis=1)
    # Fold LN1 affine (g1, be1) into wqkv / bqkv.
    g1, be1 = params["g1"][0], params["be1"][0]
    bqkv = (be1 @ wqkv)[None, :] + bqkv                        # f32 bias
    wqkv = (wqkv * g1[:, None]).astype(bf16)
    # Head-major output projection weight.
    wo_h = params["wo"].reshape(n_heads, hs, E).astype(bf16)
    # Fold LN2 affine (g2, be2) into fc1.
    g2, be2 = params["g2"][0], params["be2"][0]
    bf1 = (be2 @ params["wf1"])[None, :] + params["bf1"]       # f32 bias
    wf1 = (params["wf1"] * g2[:, None]).astype(bf16)
    wf2 = params["wf2"].astype(bf16)

    vmem_budget = 64 * 1024 * 1024   # explicit budget (>= default scoped limit, <= v7x physical)

    # ---- pass 1: LN1 + fused QKV projection (bf16 MXU, bf16 output) ----
    qkv = pl.pallas_call(
        ln_qkv_kernel,
        out_shape=jax.ShapeDtypeStruct((B, T, 3 * E), bf16),
        grid_spec=pltpu.PrefetchScalarGridSpec(
            num_scalar_prefetch=0,
            grid=(B, T // TQ),
            in_specs=[
                pl.BlockSpec((1, TQ, E), lambda b, i: (b, i, 0)),      # x tile
                pl.BlockSpec((E, 3 * E), lambda b, i: (0, 0)),         # fused Wqkv (bf16)
                pl.BlockSpec((1, 3 * E), lambda b, i: (0, 0)),         # fused bias (f32)
            ],
            out_specs=pl.BlockSpec((1, TQ, 3 * E), lambda b, i: (b, i, 0)),
        ),
        compiler_params=pltpu.CompilerParams(
            dimension_semantics=("parallel", "parallel"),
            vmem_limit_bytes=vmem_budget),
    )(x, wqkv, bqkv)

    # Head-major q/v: (B*H, T, hs); K pre-transposed: (B*H, hs, T). Done in XLA (bf16, so this
    # round trip is half the traffic it used to be).
    # TODO(synk): emit these layouts directly from kernel 1 to remove the round trip entirely.
    q, k, v = jnp.split(qkv, 3, axis=-1)
    qh = q.reshape(B, T, n_heads, hs).transpose(0, 2, 1, 3).reshape(B * n_heads, T, hs)
    vh = v.reshape(B, T, n_heads, hs).transpose(0, 2, 1, 3).reshape(B * n_heads, T, hs)
    khT = k.reshape(B, T, n_heads, hs).transpose(0, 2, 3, 1).reshape(B * n_heads, hs, T)

    kernel2 = functools.partial(attn_ffn_kernel, n_heads=n_heads, tq=TQ, tk=TK)

    # Causal DMA clamp: kv tiles fully above the diagonal reuse the last resident block.
    def k_map(b, i, j):
        return (b, 0, jnp.minimum(j, ((i + 1) * TQ - 1) // TK))

    def v_map(b, i, j):
        return (b, jnp.minimum(j, ((i + 1) * TQ - 1) // TK), 0)

    # ---- pass 2: flash attention + Wo + residual + LN2 + FFN + residual ----
    return pl.pallas_call(
        kernel2,
        out_shape=jax.ShapeDtypeStruct((B, T, E), x.dtype),
        grid_spec=pltpu.PrefetchScalarGridSpec(
            num_scalar_prefetch=0,
            grid=(B, T // TQ, T // TK),
            in_specs=[
                pl.BlockSpec((1, TQ, E), lambda b, i, j: (b, i, 0)),           # x (residual, f32)
                pl.BlockSpec((n_heads, TQ, hs), lambda b, i, j: (b, i, 0)),    # q (head-major bf16)
                pl.BlockSpec((n_heads, hs, TK), k_map),                        # k^T (clamped)
                pl.BlockSpec((n_heads, TK, hs), v_map),                        # v   (clamped)
                pl.BlockSpec((n_heads, hs, E), lambda b, i, j: (0, 0, 0)),     # Wo (head-major bf16)
                pl.BlockSpec((1, E), lambda b, i, j: (0, 0)),                  # bo
                pl.BlockSpec((E, HID), lambda b, i, j: (0, 0)),                # fc1 W (bf16, g2 folded)
                pl.BlockSpec((1, HID), lambda b, i, j: (0, 0)),                # fc1 b (be2 folded)
                pl.BlockSpec((HID, E), lambda b, i, j: (0, 0)),                # fc2 W (bf16)
                pl.BlockSpec((1, E), lambda b, i, j: (0, 0)),                  # fc2 b
            ],
            out_specs=pl.BlockSpec((1, TQ, E), lambda b, i, j: (b, i, 0)),
            scratch_shapes=[
                pltpu.VMEM((n_heads, TQ, 1), jnp.float32),    # running row max
                pltpu.VMEM((n_heads, TQ, 1), jnp.float32),    # running row sum
                pltpu.VMEM((n_heads, TQ, hs), jnp.float32),   # unnormalized p@v accumulator
            ],
        ),
        compiler_params=pltpu.CompilerParams(
            dimension_semantics=("parallel", "parallel", "arbitrary"),
            vmem_limit_bytes=vmem_budget),
    )(x, qh, khT, vh, wo_h, params["bo"], wf1, bf1, wf2, params["bf2"])


# ------------------------------------ reference ------------------------------------
def reference_block(x, params, *, n_heads: int):
    """Pure-JAX f32 reference mirroring the PyTorch Block forward (dropout = identity)."""
    B, T, E = x.shape
    hs = E // n_heads

    def ln(h, g, b):
        mu = jnp.mean(h, axis=-1, keepdims=True)
        var = jnp.mean((h - mu) ** 2, axis=-1, keepdims=True)
        return (h - mu) / jnp.sqrt(var + 1e-5) * g[0] + b[0]

    h1 = ln(x, params["g1"], params["be1"])
    q = h1 @ params["wq"] + params["bq"][0]
    k = h1 @ params["wk"] + params["bk"][0]
    v = h1 @ params["wv"] + params["bv"][0]
    q = q.reshape(B, T, n_heads, hs).transpose(0, 2, 1, 3)
    k = k.reshape(B, T, n_heads, hs).transpose(0, 2, 1, 3)
    v = v.reshape(B, T, n_heads, hs).transpose(0, 2, 1, 3)
    s = (q @ k.transpose(0, 1, 3, 2)) * (hs ** -0.5)
    mask = jnp.tril(jnp.ones((T, T)))[None, None]
    s = jnp.where(mask == 0, -jnp.inf, s)
    p = jax.nn.softmax(s, axis=-1)
    a = (p @ v).transpose(0, 2, 1, 3).reshape(B, T, E)
    a = a @ params["wo"] + params["bo"][0]
    x1 = x + a
    h2 = ln(x1, params["g2"], params["be2"])
    f = h2 @ params["wf1"] + params["bf1"][0]
    f = jax.nn.gelu(f, approximate=False)
    f = f @ params["wf2"] + params["bf2"][0]
    return x1 + f


if __name__ == "__main__":
    B, T, E, n_heads = 2, 8, 32, 4
    HID = 4 * E
    key = jax.random.PRNGKey(0)
    keys = jax.random.split(key, 16)

    def w(k, shape, scale=0.02):
        return (scale * jax.random.normal(k, shape)).astype(jnp.float32)

    params = {
        "wq": w(keys[0], (E, E)), "bq": w(keys[1], (1, E)),
        "wk": w(keys[2], (E, E)), "bk": w(keys[3], (1, E)),
        "wv": w(keys[4], (E, E)), "bv": w(keys[5], (1, E)),
        "wo": w(keys[6], (E, E)), "bo": w(keys[7], (1, E)),
        "g1": jnp.ones((1, E), jnp.float32), "be1": jnp.zeros((1, E), jnp.float32),
        "g2": jnp.ones((1, E), jnp.float32), "be2": jnp.zeros((1, E), jnp.float32),
        "wf1": w(keys[8], (E, HID)), "bf1": w(keys[9], (1, HID)),
        "wf2": w(keys[10], (HID, E)), "bf2": w(keys[11], (1, E)),
    }

    x = jax.random.normal(keys[12], (B, T, E), jnp.float32)

    out = transformer_block(x, params, n_heads=n_heads)
    out = jax.block_until_ready(out)

    ref = reference_block(x, params, n_heads=n_heads)
    assert out.shape == (B, T, E)
    # bf16 MXU operands + approximate softmax reciprocal => relaxed tolerance vs f32 reference.
    assert jnp.allclose(out, ref, atol=2e-2, rtol=2e-2), "mismatch vs reference"

    print("KERNEL_OK")
</pallas_src>

<mosaic_0001>
module attributes {stable_mosaic.version = 11 : i64} {
  func.func @ln_qkv_kernel(%arg0: i32, %arg1: i32, %arg2: memref<1x8x32xf32, #tpu.memory_space<vmem>>, %arg3: memref<32x96xbf16, #tpu.memory_space<vmem>>, %arg4: memref<1x96xf32, #tpu.memory_space<vmem>>, %arg5: memref<1x8x96xbf16, #tpu.memory_space<vmem>>) attributes {dimension_semantics = [#tpu.dimension_semantics<parallel>, #tpu.dimension_semantics<parallel>], iteration_bounds = array<i64: 2, 1>, scalar_prefetch = 0 : i64, scratch_operands = 0 : i64, tpu.core_type = #tpu.core_type<tc>, window_params = [{transform_indices = @transform_0, window_bounds = array<i64: 1, 8, 32>}, {pipeline_mode = #tpu.pipeline_mode<synchronous>, transform_indices = @transform_1, window_bounds = array<i64: 32, 96>}, {pipeline_mode = #tpu.pipeline_mode<synchronous>, transform_indices = @transform_2, window_bounds = array<i64: 1, 96>}, {transform_indices = @transform_3, window_bounds = array<i64: 1, 8, 96>}]} {
    %c0 = arith.constant 0 : index
    %c0_0 = arith.constant 0 : index
    %c0_1 = arith.constant 0 : index
    %0 = vector.load %arg2[%c0, %c0_0, %c0_1] : memref<1x8x32xf32, #tpu.memory_space<vmem>>, vector<1x8x32xf32>
    %1 = vector.shape_cast %0 : vector<1x8x32xf32> to vector<8x32xf32>
    %cst = arith.constant dense<0.000000e+00> : vector<8xf32>
    %2 = vector.multi_reduction <add>, %1, %cst [1] : vector<8x32xf32> to vector<8xf32>
    %3 = vector.shape_cast %2 : vector<8xf32> to vector<8x1xf32>
    %cst_2 = arith.constant 3.200000e+01 : f32
    %4 = vector.broadcast %cst_2 : f32 to vector<8x1xf32>
    %5 = arith.divf %3, %4 : vector<8x1xf32>
    %6 = vector.broadcast %5 : vector<8x1xf32> to vector<8x32xf32>
    %7 = arith.subf %1, %6 : vector<8x32xf32>
    %8 = arith.mulf %7, %7 : vector<8x32xf32>
    %cst_3 = arith.constant dense<0.000000e+00> : vector<8xf32>
    %9 = vector.multi_reduction <add>, %8, %cst_3 [1] : vector<8x32xf32> to vector<8xf32>
    %10 = vector.shape_cast %9 : vector<8xf32> to vector<8x1xf32>
    %cst_4 = arith.constant 3.200000e+01 : f32
    %11 = vector.broadcast %cst_4 : f32 to vector<8x1xf32>
    %12 = arith.divf %10, %11 : vector<8x1xf32>
    %13 = vector.broadcast %5 : vector<8x1xf32> to vector<8x32xf32>
    %14 = arith.subf %1, %13 : vector<8x32xf32>
    %cst_5 = arith.constant 9.99999974E-6 : f32
    %15 = vector.broadcast %cst_5 : f32 to vector<8x1xf32>
    %16 = arith.addf %12, %15 : vector<8x1xf32>
    %17 = math.rsqrt %16 : vector<8x1xf32>
    %18 = vector.broadcast %17 : vector<8x1xf32> to vector<8x32xf32>
    %19 = arith.mulf %14, %18 : vector<8x32xf32>
    %20 = arith.truncf %19 : vector<8x32xf32> to vector<8x32xbf16>
    %c0_6 = arith.constant 0 : index
    %c0_7 = arith.constant 0 : index
    %21 = vector.load %arg3[%c0_6, %c0_7] : memref<32x96xbf16, #tpu.memory_space<vmem>>, vector<32x96xbf16>
    %cst_8 = arith.constant dense<0.000000e+00> : vector<8x96xf32>
    %22 = tpu.matmul %20, %21, %cst_8 {dimension_numbers = #tpu.dot_dimension_numbers<[1], [0], [0], [1], [0, 0, 1, 1], [], []>} : vector<8x32xbf16>, vector<32x96xbf16>, vector<8x96xf32> -> vector<8x96xf32>
    %c0_9 = arith.constant 0 : index
    %c0_10 = arith.constant 0 : index
    %23 = vector.load %arg4[%c0_9, %c0_10] : memref<1x96xf32, #tpu.memory_space<vmem>>, vector<1x96xf32>
    %24 = vector.shape_cast %23 : vector<1x96xf32> to vector<96xf32>
    %25 = vector.shape_cast %24 : vector<96xf32> to vector<1x96xf32>
    %26 = vector.broadcast %25 : vector<1x96xf32> to vector<8x96xf32>
    %27 = arith.addf %22, %26 : vector<8x96xf32>
    %28 = arith.truncf %27 : vector<8x96xf32> to vector<8x96xbf16>
    %c0_11 = arith.constant 0 : index
    %c0_12 = arith.constant 0 : index
    %c0_13 = arith.constant 0 : index
    %29 = vector.load %arg5[%c0_11, %c0_12, %c0_13] : memref<1x8x96xbf16, #tpu.memory_space<vmem>>, vector<1x8x96xbf16>
    %30 = vector.shape_cast %29 : vector<1x8x96xbf16> to vector<8x96xbf16>
    %31 = vector.shape_cast %28 : vector<8x96xbf16> to vector<1x8x96xbf16>
    tpu.vector_store %arg5[%c0_11, %c0_12, %c0_13], %31 {strides = array<i32>} : memref<1x8x96xbf16, #tpu.memory_space<vmem>>, vector<1x8x96xbf16>,
    return
  }
  func.func @transform_0(%arg0: i32, %arg1: i32) -> (i32, i32, i32) {
    %c0_i32 = arith.constant 0 : i32
    %c0_i32_0 = arith.constant 0 : i32
    return %arg0, %arg1, %c0_i32 : i32, i32, i32
  }
  func.func @transform_1(%arg0: i32, %arg1: i32) -> (i32, i32) {
    %c0_i32 = arith.constant 0 : i32
    %c0_i32_0 = arith.constant 0 : i32
    %c0_i32_1 = arith.constant 0 : i32
    return %c0_i32, %c0_i32_0 : i32, i32
  }
  func.func @transform_2(%arg0: i32, %arg1: i32) -> (i32, i32) {
    %c0_i32 = arith.constant 0 : i32
    %c0_i32_0 = arith.constant 0 : i32
    %c0_i32_1 = arith.constant 0 : i32
    return %c0_i32, %c0_i32_0 : i32, i32
  }
  func.func @transform_3(%arg0: i32, %arg1: i32) -> (i32, i32, i32) {
    %c0_i32 = arith.constant 0 : i32
    %c0_i32_0 = arith.constant 0 : i32
    return %arg0, %arg1, %c0_i32 : i32, i32, i32
  }
}

</mosaic_0001>

<bundles_post_ra>
// kernel: tpu_custom_call.1
= control target key start
LH: loop header
LB: loop body
LE: loop exit
PB: predicated region body
PF: predicated region fallthrough
CT: control target
= control target key end

     0   :  { %8 = vsyncpa [#allocation3], 0  ;;  %s1011_s0 = inlined_call_operand.hbm [shape: f32[2,8,32], index: 0, kind: input, shape index: {}]   ;;  %s1012_s1 = inlined_call_operand.hbm [shape: bf16[32,96], index: 1, kind: input, shape index: {}]   ;;  %s1013_s2 = inlined_call_operand.hbm [shape: f32[1,96], index: 2, kind: input, shape index: {}]   ;;  %s1014_s3 = inlined_call_operand.hbm [shape: bf16[2,8,96], index: 3, kind: output, shape index: {}]  }
   0x1   :  { %10 = vsyncpa [#allocation3 + $0x1], 0 }
   0x2   :  { %11 = vsyncpa [#allocation6], 0 }
   0x3   :  { %12 = vsyncpa [#allocation4], 0 }
   0x4   :  { %14 = vsyncpa [#allocation4 + $0x1], 0  ;;  %s756_s12 = smov 0   ;;  %s758_s13 = smov 0  }
   0x5   :  { %s760_s14 = smov 0   ;;  %s762_s15 = smov 0  }
   0x6   :  { %s764_s16 = smov 0   ;;  %s766_s17 = smov 0  }
   0x7 LB: > { %s431_s18 = sadd.s32 4294967295, %s726_s17   ;;  %s432_s19 = sadd.s32 4294967294, %s726_s17   ;;  %s726_s17 = sphi %s766_s17, %s20_s17   ;;  %s722_s16 = sphi %s764_s16, %s1036_s16   ;;  %s718_s15 = sphi %s762_s15, %s1035_s15   ;;  %s714_s14 = sphi %s760_s14, %s1034_s14   ;;  %s710_s13 = sphi %s758_s13, %s1033_s13   ;;  %s706_s12 = sphi %s756_s12, %s1032_s12  }
   0x8   : > { %p54_p0 = scmp.ne.s32.totalorder %s710_s13, %s706_s12  ;;  %p790_p1 = scmp.eq.s32.totalorder %s431_s18, 0 }
   0x9   : > { %p794_p2 = scmp.eq.s32.totalorder %s431_s18, 1  ;;  %p128_p3 = scmp.eq.s32.totalorder %s432_s19, 1 }
   0xa   : > { %s1019_s20 = scalar_select %p790_p1, 1, 0 }
   0xb   : > { %p800_p4 = por %p790_p1, %p54_p0  ;;  %p433_p5 = scmp.ge.s32.totalorder %s726_s17, 1 }
   0xc   : > { %p805_p6 = por %p128_p3, %p54_p0  ;;  %p135_p7 = scmp.lt.s32.totalorder %s726_s17, 3 }
   0xd   : > { %s1021_s22 = scalar_select %p800_p4, 1, 0 }
   0xe   : > { %s1022_s23 = scalar_select %p805_p6, 1, 0 }
   0xf   : > { %p810_p8 = pnand %p433_p5, %p135_p7  ;;  %s728_s25 = smov [#allocation5]  }
  0x10   : > { %s147_s26 = sshll.u32 %s728_s25, 4  ;;  %s729_s28 = smov [#allocation7]   ;;  %s814_s26 = int_to_ptr.vmem [resolvable:$true] %s147_s26 }
  0x11   : > { %p475_p9 = pneg %p810_p8  ;;  %s161_s29 = sshll.u32 %s729_s28, 4  ;;  %s825_s29 = int_to_ptr.vmem [resolvable:$true] %s161_s29 }
  0x12   : > { %s554_s5 = scalar_lea.hbm %s1012_s1, 256 }
  0x13   : > { %p821_p11 = pnand %p475_p9, %p790_p1  ;;  %p555_p12 = scmp.ne.s32.totalorder %s1012_s1, %s554_s5 }
  0x14   : > { %p561_p5 = scmp.lt.u32.totalorder %s554_s5, %s1012_s1 }
  0x15   : > { %p556_p13 = pneg %p821_p11 }
  0x17   : > { %p557_p0 = pnand %p556_p13, %p555_p12 }
  0x19   : > { %p558_p3 = pneg %p557_p0 }
  0x1b   : > { %p563_p7 = pnand %p561_p5, %p558_p3 }
  0x1d   : > { %566 = shalt.err (!%p563_p7)
}
  0x1e   : > { %s567_s10 = scalar_lea.vmem %s814_s26, 256  ;;  %p575_p1 = scmp.lt.s32.totalorder %s814_s26, %s814_s26 }
  0x1f   : > { %p568_p9 = scmp.ne.s32.totalorder %s814_s26, %s567_s10  ;;  %p576_p12 = scmp.lt.s32.totalorder %s567_s10, %s567_s10 }
  0x21   : > { %p570_p10 = pnand %p568_p9, %p556_p13  ;;  %p577_p0 = por %p576_p12, %p575_p1 }
  0x23   : > { %p571_p6 = pneg %p570_p10 }
  0x25   : > { %p578_p4 = pnand %p577_p0, %p571_p6 }
  0x27   : > { %581 = shalt.err (!%p578_p4)
}
  0x28   : > { %s730_s11 = smov 64   ;;  %s731_s18 = smov 4  }
  0x29   : > { %478 = dma.hbm_to_vmem [thread:$0]  (!%p821_p11), %s1012_s1, 256, %s814_s26, [#allocation6], %s730_s11, %s730_s11, %s731_s18  }
  0x2a   : > { %s582_s4 = scalar_lea.hbm %s1013_s2, 16 }
  0x2b   : > { %p583_p1 = scmp.ne.s32.totalorder %s1013_s2, %s582_s4  ;;  %p589_p10 = scmp.lt.u32.totalorder %s582_s4, %s1013_s2 }
  0x2d   : > { %p585_p4 = pnand %p583_p1, %p556_p13 }
  0x2f   : > { %p586_p6 = pneg %p585_p4 }
  0x31   : > { %p591_p3 = pnand %p589_p10, %p586_p6 }
  0x33   : > { %594 = shalt.err (!%p591_p3)
}
  0x34   : > { %s595_s26 = scalar_lea.vmem %s825_s29, 16  ;;  %s602_s9 = scalar_lea.vmem %s825_s29, 32 }
  0x35   : > { %p596_p5 = scmp.ne.s32.totalorder %s825_s29, %s595_s26  ;;  %p603_p12 = scmp.lt.s32.totalorder %s825_s29, %s825_s29 }
  0x36   : > { %p604_p0 = scmp.lt.s32.totalorder %s602_s9, %s595_s26 }
  0x37   : > { %p598_p7 = pnand %p596_p5, %p556_p13 }
  0x38   : > { %p605_p1 = por %p604_p0, %p603_p12 }
  0x39   : > { %p599_p9 = pneg %p598_p7 }
  0x3b   : > { %p606_p4 = pnand %p605_p1, %p599_p9 }
  0x3d   : > { %609 = shalt.err (!%p606_p4)
}
  0x3e   : > { %481 = dma.hbm_to_vmem [thread:$0]  (!%p821_p11), %s1013_s2, 16, %s825_s29, [#allocation6]  }
  0x3f   : > { %s32_s18 = sadd.s32 1, %s722_s16  ;;  %s41_s19 = sadd.s32 1, %s714_s14 }
  0x40   : > { %p34_p13 = scmp.ge.s32.totalorder %s32_s18, 2  ;;  %p48_p6 = scmp.ne.s32.totalorder %s714_s14, %s710_s13 }
  0x41   : > { %p49_p10 = scmp.eq.s32.totalorder %s726_s17, 0  ;;  %p492_p3 = scmp.lt.s32.totalorder %s726_s17, 2 }
  0x42   : > { %s1038_s18 = smov (%p34_p13, %s32_s18), 0  ;;  %p890_p7 = por %p794_p2, %p48_p6 }
  0x43   : > { %p50_p5 = por %p49_p10, %p48_p6  ;;  %s36_s25 = ssub.s32 %s722_s16, %s1038_s18 }
  0x44   : > { %s1025_s27 = scalar_select %p890_p7, 1, 0 }
  0x45   : > { %s172_s28 = sand.u32 1, %s714_s14   ;;  %p39_p9 = scmp.eq.s32.totalorder %s36_s25, 0 }
  0x46   : > { %s437_s29 = sshll.u32 %s172_s28, 3  ;;  %s438_s30 = sshll.u32 %s722_s16, 7 }
  0x47   : > { %s899_s4 = scalar_select %p39_p9, %s714_s14, %s41_s19  }
  0x48   : > { %s904_s7 = scalar_lea.hbm %s1011_s0, %s438_s30  ;;  %s176_s21 = scalar_lea.vmem [#allocation2], %s437_s29 }
  0x49   : > { %s184_s8 = sshll.u32 %s176_s21, 4  ;;  %p908_p2 = pnand %p492_p3, %p50_p5  ;;  %s912_s8 = int_to_ptr.vmem [resolvable:$true] %s184_s8 }
  0x4a   : > { %s173_s9 = scalar_lea.sflag [#allocation3], %s172_s28  ;;  %s610_s10 = scalar_lea.hbm %s904_s7, 128 }
  0x4b   : > { %p611_p11 = scmp.ne.s32.totalorder %s904_s7, %s610_s10  ;;  %p612_p12 = pneg %p908_p2 }
  0x4c   : > { %s615_s25 = scalar_lea.hbm %s1011_s0, 256  ;;  %p616_p4 = scmp.lt.u32.totalorder %s904_s7, %s1011_s0 }
  0x4d   : > { %p613_p0 = pnand %p612_p12, %p611_p11  ;;  %p617_p13 = scmp.lt.u32.totalorder %s615_s25, %s610_s10 }
  0x4e   : > { %p619_p10 = scmp.lt.u32.totalorder %s610_s10, %s904_s7 }
  0x4f   : > { %p614_p1 = pneg %p613_p0  ;;  %p618_p6 = por %p617_p13, %p616_p4 }
  0x51   : > { %p620_p3 = por %p619_p10, %p618_p6 }
  0x53   : > { %p621_p5 = pnand %p620_p3, %p614_p1 }
  0x55   : > { %624 = shalt.err (!%p621_p5)
}
  0x56   : > { %s625_s28 = scalar_lea.vmem %s912_s8, 128  ;;  %s732_s5 = smov [#allocation2]  }
  0x57   : > { %p626_p9 = scmp.ne.s32.totalorder %s912_s8, %s625_s28  ;;  %s630_s6 = sshll.u32 %s732_s5, 4  ;;  %s631_s6 = int_to_ptr.vmem [resolvable:$false] %s630_s6 }
  0x58   : > { %s632_s21 = scalar_lea.vmem %s631_s6, 256  ;;  %p633_p7 = scmp.lt.s32.totalorder %s912_s8, %s631_s6 }
  0x59   : > { %p628_p11 = pnand %p626_p9, %p612_p12  ;;  %p634_p4 = scmp.lt.s32.totalorder %s632_s21, %s625_s28 }
  0x5b   : > { %p629_p0 = pneg %p628_p11  ;;  %p635_p13 = por %p634_p4, %p633_p7 }
  0x5d   : > { %p636_p6 = pnand %p635_p13, %p629_p0 }
  0x5f   : > { %639 = shalt.err (!%p636_p6)
}
  0x60   : > { %485 = dma.hbm_to_vmem [thread:$0]  (!%p908_p2), %s904_s7, 128, %s912_s8, %s173_s9  }
  0x61   : > { %193 = sbr.rel (%p810_p8) target bundleno = 650 (0x28a), region = 32  ;;  %s942_s10 = sand.u32 (!%p810_p8), 1, %s710_s13  }
  0x62   : > { %s440_s11 = sshll.u32 (!%p810_p8), %s942_s10, 3  ;;  %s196_s19 = scalar_lea.sflag (!%p810_p8), [#allocation3], %s942_s10 }
  0x63   : > { %s199_s25 = scalar_lea.vmem (!%p810_p8), [#allocation2], %s440_s11  ;;  %p1027_p7 = scmp.ne.s32.totalorder (!%p810_p8), %s1021_s22, 0 }
  0x68   : > { %693 = dma.done.wait (%p1027_p7), %s196_s19, 128  }
  0x69   : > { %695 = vsyncadd (%p1027_p7), %s196_s19, 4294967168  ;;  %p1028_p12 = scmp.ne.s32.totalorder %s1019_s20, 0 }
  0x6b   : > { %697 = dma.done.wait (%p1028_p12), [#allocation6], 272  }
  0x6c   : > { %699 = vsyncadd (%p1028_p12), [#allocation6], 4294967024  ;;  %vm232_vm0 = vcmask 261120   ;;  %v231_v0 = vld [vmem:[%s199_s25] sm:$0xff]  ;;  %v550_v7 = vld [vmem:[#allocation5] sm:$0xff]   ;;  %v733_v8 = vmov 0.0  }
  0x6d   : > { %v233_v1 = vsel %vm232_vm0, %v231_v0, 0.0  ;;  %455 = vmatprep.subr.bf16.mxu0 %v733_v8  ;;  %vm734_vm1 = vmmov 0   ;;  %v551_v9 = vld [vmem:[#allocation5 + $0x8] sm:$0xff]   ;;  %s443_s20 = sshll.u32 %s942_s10, 2  ;;  %v444_v16 = vld [vmem:[#allocation7] ss:$0 sm:$0xff] }
  0x6e   : > { %234 = vadd.xlane.f32.xlu0 %v233_v1  ;;  %459 = vmatprep.mubr.msk.bf16.mxu0 %vm734_vm1, %v733_v8  ;;  %s449_s22 = sshll.u32 %s718_s15, 6  ;;  %s229_s24 = scalar_lea.vmem [#allocation8], %s443_s20  ;;  %vm315_vm2 = vcmask 781312  }
  0x6f   : > { %456 = vmatpush3.bf16.msra.mxu0 %v550_v7  ;;  %s332_s7 = sshll.u32 %s229_s24, 4  ;;  %s962_s9 = scalar_lea.hbm %s1014_s3, %s449_s22  ;;  %s964_s7 = int_to_ptr.vmem [resolvable:$true] %s332_s7 }
  0x70   : > { %457 = vmatprep.subr.bf16.mxu0 %v733_v8  ;;  %s318_s15 = scalar_lea.sflag [#allocation4], %s942_s10  ;;  %s640_s29 = scalar_lea.vmem %s964_s7, 64 }
  0x71   : > { %p641_p8 = scmp.ne.s32.totalorder %s964_s7, %s640_s29  ;;  %p1029_p2 = scmp.ne.s32.totalorder %s1025_s27, 0 }
  0x72   : > { %s735_s30 = smov [#allocation8]  }
  0x73   : > { %458 = vmatpush3.bf16.msra.mxu0 %v551_v9  ;;  %p642_p1 = pnand %p641_p8, %p1029_p2  ;;  %s644_s28 = sshll.u32 %s735_s30, 4  ;;  %s645_s28 = int_to_ptr.vmem [resolvable:$false] %s644_s28 }
  0x74   : > { %s646_s5 = scalar_lea.vmem %s645_s28, 128  ;;  %p647_p3 = scmp.lt.s32.totalorder %s964_s7, %s645_s28 }
  0x75   : > { %p643_p10 = pneg %p642_p1  ;;  %p648_p5 = scmp.lt.s32.totalorder %s646_s5, %s640_s29 }
  0x77   : > { %p649_p9 = por %p648_p5, %p647_p3 }
  0x79   : > { %p650_p11 = pnand %p649_p9, %p643_p10 }
  0xfb   : > { %v235_v2 = vpop.xlane.xlu0 %234 }
  0xfc   : > { %v237_v3 = vmul.f32 0.03125, %v235_v2 }
  0xfe   : > { %v238_v4 = vsub.f32 %v231_v0, %v237_v3 }
 0x100   : > { %v239_v5 = vmul.f32 %v238_v4, %v238_v4 }
 0x102   : > { %v240_v6 = vsel %vm232_vm0, %v239_v5, 0.0 }
 0x103   : > { %241 = vadd.xlane.f32.xlu0 %v240_v6 }
 0x190   : > { %v242_v10 = vpop.xlane.xlu0 %241 }
 0x191   : > { %v243_v11 = vmul.f32 0.03125, %v242_v10 }
 0x193   : > { %v244_v12 = vadd.f32 1e-05, %v243_v11 }
 0x195   : > { %552 = vrsqrt.f32 %v244_v12 }
 0x19f   : > { %v553_v13 = vpop.eup %552 }
 0x1a0   : > { %v246_v14 = vmul.f32 %v553_v13, %v238_v4 }
 0x1a2   : > { %v247_v15 = vpack.c.bf16 %v246_v14, %v246_v14 }
 0x1a4   : > { %460 = vmatmul.mubr.msk.bf16.vlgmr.msra.gmra.mrb[0].mxu0 %vm232_vm0, %v247_v15 }
 0x277   : > { %v308_v17 = vpop.f32.mrb[0].mxu0 }
 0x278   : > { %v309_v18 = vadd.f32 %v444_v16, %v308_v17  ;;  %v461_v19 = vpop.f32.mrb[1].mxu0 }
 0x279   : > { %v311_v20 = vpop.f32.mrb[2].mxu0 }
 0x27a   : > { %v314_v21 = vpack.c.bf16 %v309_v18, %v309_v18  ;;  %v462_v22 = vpop.f32.mrb[3].mxu0 }
 0x27c   : > { %316 = vst.msk [vmem:[%s229_s24] sm:$0xf] %vm315_vm2, %v314_v21 }
 0x27d   : > { %653 = shalt.err (!%p650_p11)
}
 0x27e   : > { %s654_s6 = scalar_lea.hbm %s962_s9, 64  ;;  %s658_s11 = scalar_lea.hbm %s1014_s3, 128 }
 0x27f   : > { %p655_p0 = scmp.ne.s32.totalorder %s962_s9, %s654_s6  ;;  %p659_p6 = scmp.lt.u32.totalorder %s962_s9, %s1014_s3 }
 0x280   : > { %p660_p7 = scmp.lt.u32.totalorder %s658_s11, %s654_s6  ;;  %p662_p8 = scmp.lt.u32.totalorder %s654_s6, %s962_s9 }
 0x281   : > { %p656_p4 = pnand %p655_p0, %p1029_p2 }
 0x282   : > { %p661_p12 = por %p660_p7, %p659_p6 }
 0x283   : > { %p657_p13 = pneg %p656_p4 }
 0x284   : > { %p663_p1 = por %p662_p8, %p661_p12 }
 0x286   : > { %p664_p10 = pnand %p663_p1, %p657_p13 }
 0x288   : > { %667 = shalt.err (!%p664_p10)
}
 0x289   : > { %473 = dma.vmem_to_hbm [thread:$0]  (%p1029_p2), %s964_s7, 64, %s962_s9, %s318_s15  }
 0x28a PF: > { %s344_s20 = sand.u32 1, %s706_s12   ;;  %p1030_p3 = scmp.ne.s32.totalorder %s1022_s23, 0 }
 0x28b   : > { %p1031_p5 = scmp.ge.s32.totalorder %s726_s17, 2  ;;  %s345_s22 = scalar_lea.sflag [#allocation4], %s344_s20 }
 0x28d   : > { %p487_p9 = pnand %p1031_p5, %p1030_p3 }
 0x28f   : > { %701 = dma.done.wait (!%p487_p9), %s345_s22, 64  }
 0x290   : > { %703 = vsyncadd (!%p487_p9), %s345_s22, 4294967232  ;;  %s20_s17 = sadd.s32 1, %s726_s17   ;;  %s1032_s12 = smov %s710_s13 }
 0x291   : > { %p17_p11 = scmp.ge.s32.totalorder %s20_s17, 4   ;;  %s1033_s13 = smov %s714_s14 }
 0x292   : > { %s1034_s14 = smov %s899_s4  ;;  %s1035_s15 = smov %s722_s16 }
 0x293   : > { %s1036_s16 = smov %s1038_s18  ;;  %19 = sbr.rel (!%p17_p11) target bundleno = 7 (0x7), region = 85 }
 0x29a   :  { %350 = vsyncpa [#allocation3], 1 }
 0x29b   :  { %352 = vsyncpa [#allocation3 + $0x1], 1 }
 0x29c   :  { %353 = vsyncpa [#allocation6], 1 }
 0x29d   :  { %354 = vsyncpa [#allocation4], 1 }
 0x29e   :  { %356 = vsyncpa [#allocation4 + $0x1], 1 }

</bundles_post_ra>
